<compile_context>
chip_gen: v6e
topology: v6e:2x2x1
jax: 0.10.0
libtpu: 0.0.40
codegen_flags: <defaults>
</compile_context>

<pallas_src>
import functools

import numpy as np
import jax
import jax.numpy as jnp
from jax.experimental import pallas as pl
from jax.experimental.pallas import tpu as pltpu

DST_TILE = 128               # dst rows per grid step (softmax rows are independent)
SUB_TILE = 128               # src columns per inner sub-chunk (keeps e/p at [128,128])
SRC_BLK_MAX = 512            # src columns streamed per grid step
NEG = -1e30
VMEM_LIMIT = 32 * 1024 * 1024   # safe on v5e/v6e/v7x; working set here is far smaller
# exp dtype for attention probabilities.  Set to jnp.bfloat16 on v6e/v7x for ~2x EUP
# throughput; keep f32 on v5e (no bf16 EUP/VPU).
EXP_DTYPE = jnp.float32


def _round_up(x, m):
    return ((x + m - 1) // m) * m


# ----------------------------------------------------------------------------- kernels
def _proj_kernel(x_ref, w_ref, h_ref, al_ref, *, feat):
    """Fused projection: y = x @ [W | W@a_src | W@a_dst] (one MXU matmul).

    h  = y[:, :feat]   -> bf16 transformed node features
    al = y[:, feat:]   -> f32 [alpha_src | alpha_dst] (2*heads columns)
    """
    y = jnp.dot(x_ref[...], w_ref[...], preferred_element_type=jnp.float32)
    h_ref[...] = y[:, :feat].astype(h_ref.dtype)
    al_ref[...] = y[:, feat:]


def _gat_attn_kernel(tbl_ref, cnt_ref,        # scalar prefetch (SMEM, 1-D int32)
                     adj_ref,                 # [T, SRC_BLK] int8 0/1 adjacency block
                     ad_ref,                  # [T, H]       f32 alpha_dst (dst tile)
                     ast_ref,                 # [H, SRC_BLK] f32 alpha_src^T (src block)
                     h_ref,                   # [SRC_BLK, F] bf16 projected src features
                     b_ref,                   # [1, F]       f32 layer bias
                     out_ref,                 # [T, F]
                     m_sc, l_sc, acc_sc,      # scratch [T,H], [T,H], [T,F] f32
                     *, heads, c_out, sub, activation):
    i = pl.program_id(0)
    j = pl.program_id(1)

    @pl.when(j == 0)
    def _init():
        m_sc[...] = jnp.full(m_sc.shape, NEG, dtype=m_sc.dtype)
        l_sc[...] = jnp.zeros(l_sc.shape, dtype=l_sc.dtype)
        acc_sc[...] = jnp.zeros(acc_sc.shape, dtype=acc_sc.dtype)

    # Only the first cnt[i] grid steps carry real (non-empty) src blocks.
    @pl.when(j < cnt_ref[i])
    def _compute():
        ad = ad_ref[...]                 # [T, H]
        ast = ast_ref[...]               # [H, SRC_BLK]
        m_prev = m_sc[...]               # [T, H]
        rows = ad.shape[0]

        # Per-head running max for this src block.  GAT scores are additive, so
        #   max_src lrelu(ad + ast) = lrelu(ad + max_src ast)   (LeakyReLU monotone)
        # -> no [T, SRC_BLK] row-max needed.  The unmasked max is a safe upper bound.
        m_news, corrs, rowsums, deltas = [], [], [], []
        for k in range(heads):                                     # heads is small & static
            smax = jnp.max(ast[k:k + 1, :], axis=1, keepdims=True)   # [1,1]
            rmax = ad[:, k:k + 1] + smax                             # [T,1]
            rmax = jnp.maximum(rmax, 0.2 * rmax)                     # LeakyReLU(0.2)
            m_new = jnp.maximum(m_prev[:, k:k + 1], rmax)            # [T,1]
            m_news.append(m_new)
            corrs.append(jnp.exp(m_prev[:, k:k + 1] - m_new))
            rowsums.append(jnp.zeros((rows, 1), jnp.float32))
            deltas.append(jnp.zeros((rows, c_out), jnp.float32))

        # 128-wide src sub-chunks: e/p stay at [T,128]; mask cast hoisted per sub-chunk.
        for s in range(sub):
            lo_s = s * SUB_TILE
            mask_f = adj_ref[:, lo_s:lo_s + SUB_TILE].astype(jnp.float32)  # [T,128]
            h_s = h_ref[lo_s:lo_s + SUB_TILE, :]                           # [128,F] bf16
            for k in range(heads):
                e = ad[:, k:k + 1] + ast[k:k + 1, lo_s:lo_s + SUB_TILE]    # [T,128]
                e = jnp.maximum(e, 0.2 * e)                                # LeakyReLU(0.2)
                p = jnp.exp((e - m_news[k]).astype(EXP_DTYPE)).astype(jnp.float32)
                p = p * mask_f                                             # multiplicative edge mask
                rowsums[k] = rowsums[k] + jnp.sum(p, axis=1, keepdims=True)
                deltas[k] = deltas[k] + jnp.dot(
                    p.astype(jnp.bfloat16), h_s[:, k * c_out:(k + 1) * c_out],
                    preferred_element_type=jnp.float32)

        # single scratch update per head per grid step
        for k in range(heads):
            lo = k * c_out
            m_sc[:, k:k + 1] = m_news[k]
            l_sc[:, k:k + 1] = corrs[k] * l_sc[:, k:k + 1] + rowsums[k]
            acc_sc[:, lo:lo + c_out] = corrs[k] * acc_sc[:, lo:lo + c_out] + deltas[k]

    @pl.when(j == pl.num_programs(1) - 1)
    def _finalize():
        inv_l = pl.reciprocal(l_sc[...], approx=True)                 # [T,H]
        for k in range(heads):
            lo = k * c_out
            acc_sc[:, lo:lo + c_out] = acc_sc[:, lo:lo + c_out] * inv_l[:, k:k + 1]
        res = acc_sc[...] + b_ref[...]
        out_ref[...] = activation(res).astype(out_ref.dtype)


def _elu(v):
    return jnp.where(v > 0.0, v, jnp.exp(v) - 1.0)


def _log_softmax(v):
    m = jnp.max(v, axis=1, keepdims=True)
    z = v - m
    return z - jnp.log(jnp.sum(jnp.exp(z), axis=1, keepdims=True))


# ----------------------------------------------------------------------------- wrappers
def _project(x, w, a_src, a_dst, *, proj_tile):
    """h = x@W (bf16), alpha_src = x@(W a_src), alpha_dst = x@(W a_dst), one fused matmul."""
    n_pad, in_f = x.shape
    heads, c_out = a_src.shape
    feat = heads * c_out

    w3 = w.reshape(in_f, heads, c_out)
    wa_src = jnp.einsum('ihc,hc->ih', w3, a_src)
    wa_dst = jnp.einsum('ihc,hc->ih', w3, a_dst)
    w_all = jnp.concatenate([w, wa_src, wa_dst], axis=1).astype(jnp.bfloat16)  # [in_f, feat+2H]

    nt = n_pad // proj_tile
    h, alphas = pl.pallas_call(
        functools.partial(_proj_kernel, feat=feat),
        out_shape=(jax.ShapeDtypeStruct((n_pad, feat), jnp.bfloat16),
                   jax.ShapeDtypeStruct((n_pad, 2 * heads), jnp.float32)),
        grid_spec=pltpu.PrefetchScalarGridSpec(
            num_scalar_prefetch=0, grid=(nt,),
            in_specs=[pl.BlockSpec((proj_tile, in_f), lambda i: (i, 0)),
                      pl.BlockSpec((in_f, feat + 2 * heads), lambda i: (0, 0))],
            out_specs=[pl.BlockSpec((proj_tile, feat), lambda i: (i, 0)),
                       pl.BlockSpec((proj_tile, 2 * heads), lambda i: (i, 0))]),
        compiler_params=pltpu.CompilerParams(
            dimension_semantics=("parallel",),
            vmem_limit_bytes=VMEM_LIMIT),
    )(x.astype(jnp.bfloat16), w_all)

    a_s_t = alphas[:, :heads].T          # [H, n_pad]  (tiny host-side layout transform)
    a_d = alphas[:, heads:]              # [n_pad, H]
    return h, a_s_t, a_d


def _gat_layer(x, graph, w, a_src, a_dst, b, *, activation, out_dtype, proj_tile):
    adj, blk_tbl, counts, max_nnz, src_blk = graph
    n_pad = x.shape[0]
    heads, c_out = a_src.shape
    feat = heads * c_out
    nd = n_pad // DST_TILE
    sub = src_blk // SUB_TILE

    h, a_s_t, a_d = _project(x, w, a_src, a_dst, proj_tile=proj_tile)

    out = pl.pallas_call(
        functools.partial(_gat_attn_kernel, heads=heads, c_out=c_out, sub=sub,
                          activation=activation),
        out_shape=jax.ShapeDtypeStruct((n_pad, feat), out_dtype),
        grid_spec=pltpu.PrefetchScalarGridSpec(
            num_scalar_prefetch=2,
            grid=(nd, max_nnz),
            in_specs=[
                # int8 adjacency block for (dst tile i, src block tbl[i*max_nnz + j])
                pl.BlockSpec((DST_TILE, src_blk),
                             lambda i, j, tbl, cnt: (i, tbl[i * max_nnz + j])),
                pl.BlockSpec((DST_TILE, heads),
                             lambda i, j, tbl, cnt: (i, 0)),          # alpha_dst
                pl.BlockSpec((heads, src_blk),
                             lambda i, j, tbl, cnt: (0, tbl[i * max_nnz + j])),  # alpha_src^T
                pl.BlockSpec((src_blk, feat),
                             lambda i, j, tbl, cnt: (tbl[i * max_nnz + j], 0)),  # h (src rows)
                pl.BlockSpec((1, feat),
                             lambda i, j, tbl, cnt: (0, 0)),          # layer bias
            ],
            out_specs=pl.BlockSpec((DST_TILE, feat),
                                   lambda i, j, tbl, cnt: (i, 0)),
            scratch_shapes=[pltpu.VMEM((DST_TILE, heads), jnp.float32),
                            pltpu.VMEM((DST_TILE, heads), jnp.float32),
                            pltpu.VMEM((DST_TILE, feat), jnp.float32)]),
        compiler_params=pltpu.CompilerParams(
            dimension_semantics=("parallel", "arbitrary"),
            vmem_limit_bytes=VMEM_LIMIT),
    )(blk_tbl, counts, adj, a_d, a_s_t, h, b)
    return out


def build_graph(edge_index, n):
    """Host-side: dense int8 adjacency (with self-loops, PyG GATConv default) plus a
    compacted per-dst-tile table of non-empty src blocks (1-D, scalar-prefetched so
    empty blocks are never DMA'd)."""
    n_pad = _round_up(n, DST_TILE)
    if n_pad >= SRC_BLK_MAX:
        n_pad = _round_up(n_pad, SRC_BLK_MAX)
        src_blk = SRC_BLK_MAX
    else:
        src_blk = n_pad

    src = np.asarray(edge_index[0])
    dst = np.asarray(edge_index[1])
    adj = np.zeros((n_pad, n_pad), np.int8)
    adj[dst, src] = 1
    diag = np.arange(n_pad)
    adj[diag, diag] = 1          # self-loops; also keeps every softmax row non-empty

    nd = n_pad // DST_TILE
    ns = n_pad // src_blk
    blk = adj.reshape(nd, DST_TILE, ns, src_blk).sum(axis=(1, 3)) > 0   # [nd, ns]
    counts = blk.sum(axis=1).astype(np.int32)
    max_nnz = int(counts.max())
    tbl = np.zeros((nd, max_nnz), np.int32)
    for r in range(nd):
        nz = np.nonzero(blk[r])[0]
        tbl[r, :len(nz)] = nz.astype(np.int32)
    # NOTE: dense n_pad^2 int8 adjacency is fine for Planetoid-scale graphs; for very
    # large graphs build the per-block masks from a block-sparse edge list instead.
    graph = (jnp.asarray(adj), jnp.asarray(tbl.reshape(-1)),
             jnp.asarray(counts), max_nnz, src_blk)
    return graph, n_pad


def gatnet_forward(x, edge_index, params):
    n = x.shape[0]
    graph, n_pad = build_graph(edge_index, n)
    x_pad = jnp.zeros((n_pad, x.shape[1]), x.dtype).at[:n].set(x)

    if n_pad <= 2048:
        proj_tile = n_pad          # whole projection in one grid step
    elif n_pad % 2048 == 0:
        proj_tile = 2048
    elif n_pad % 1024 == 0:
        proj_tile = 1024
    else:
        proj_tile = 512

    # layer 1: GATConv(heads=H, concat=True) -> ELU, emitted as bf16
    h1 = _gat_layer(x_pad, graph, params["w1"], params["a1_src"], params["a1_dst"],
                    params["b1"], activation=_elu, out_dtype=jnp.bfloat16,
                    proj_tile=proj_tile)
    # TODO(synk): F.dropout(p=0.6) between layers is identity in eval mode.
    # layer 2: GATConv(heads=1, concat=False) -> log_softmax
    assert params["a2_src"].shape[0] == 1, \
        "concat=False head-averaging only implemented for heads=1 (as in the module)"
    out = _gat_layer(h1, graph, params["w2"], params["a2_src"], params["a2_dst"],
                     params["b2"], activation=_log_softmax, out_dtype=jnp.float32,
                     proj_tile=proj_tile)
    return out[:n]


# ----------------------------------------------------------------------------- params / reference
def make_params(key, in_channels, out_channels, heads):
    k = jax.random.split(key, 8)
    c1 = out_channels
    glorot = lambda kk, shape: (jax.random.normal(kk, shape, jnp.float32)
                                * jnp.sqrt(2.0 / (shape[0] + shape[-1])))
    return {
        "w1":     glorot(k[0], (in_channels, heads * c1)),
        "a1_src": glorot(k[1], (heads, c1)),
        "a1_dst": glorot(k[2], (heads, c1)),
        "b1":     0.1 * jax.random.normal(k[3], (1, heads * c1), jnp.float32),
        "w2":     glorot(k[4], (heads * c1, out_channels)),
        "a2_src": glorot(k[5], (1, out_channels)),
        "a2_dst": glorot(k[6], (1, out_channels)),
        "b2":     0.1 * jax.random.normal(k[7], (1, out_channels), jnp.float32),
    }


def gatnet_reference(x, edge_index, params):
    """Pure-JAX f32 reference (PyG GATConv semantics), for correctness checking."""
    n = x.shape[0]
    src, dst = edge_index[0], edge_index[1]
    adj = jnp.zeros((n, n), jnp.float32).at[dst, src].set(1.0)
    adj = jnp.maximum(adj, jnp.eye(n, dtype=jnp.float32))

    def layer(h_in, w, a_s, a_d, b):
        heads, c = a_s.shape
        h = h_in @ w
        outs = []
        for k in range(heads):
            hk = h[:, k * c:(k + 1) * c]
            s_ = hk @ a_s[k]
            d_ = hk @ a_d[k]
            e = d_[:, None] + s_[None, :]
            e = jnp.where(e > 0, e, 0.2 * e)
            e = jnp.where(adj > 0, e, NEG)
            att = jax.nn.softmax(e, axis=1)
            outs.append(att @ hk)
        return jnp.concatenate(outs, axis=1) + b

    h1 = layer(x, params["w1"], params["a1_src"], params["a1_dst"], params["b1"])
    h1 = jnp.where(h1 > 0, h1, jnp.exp(h1) - 1.0)
    h2 = layer(h1, params["w2"], params["a2_src"], params["a2_dst"], params["b2"])
    return jax.nn.log_softmax(h2, axis=1)


# ----------------------------------------------------------------------------- main
if __name__ == "__main__":
    N, IN_CH, OUT_CH, HEADS, E = 32, 16, 8, 4, 64

    key = jax.random.PRNGKey(0)
    kx, ke1, ke2, kp = jax.random.split(key, 4)

    x = jax.random.normal(kx, (N, IN_CH), jnp.float32)
    src = jax.random.randint(ke1, (E,), 0, N)
    dst = jax.random.randint(ke2, (E,), 0, N)
    edge_index = jnp.stack([src, dst], axis=0)          # [2, E], PyG convention

    params = make_params(kp, IN_CH, OUT_CH, HEADS)

    out = gatnet_forward(x, edge_index, params)
    out = jax.block_until_ready(out)

    assert out.shape == (N, OUT_CH)
    # rows of log_softmax must exp-sum to 1
    assert bool(jnp.allclose(jnp.sum(jnp.exp(out), axis=1), 1.0, atol=1e-4))
    # agree with pure-JAX f32 reference (bf16 MXU + approx reciprocal => loose tolerance)
    ref = gatnet_reference(x, edge_index, params)
    assert bool(jnp.allclose(out, ref, atol=0.1)), float(jnp.max(jnp.abs(out - ref)))
    print("KERNEL_OK")
</pallas_src>

<mosaic_0001>
module attributes {stable_mosaic.version = 11 : i64} {
  func.func @_proj_kernel(%arg0: i32, %arg1: memref<128x16xbf16, #tpu.memory_space<vmem>>, %arg2: memref<16x40xbf16, #tpu.memory_space<vmem>>, %arg3: memref<128x32xbf16, #tpu.memory_space<vmem>>, %arg4: memref<128x8xf32, #tpu.memory_space<vmem>>) attributes {dimension_semantics = [#tpu.dimension_semantics<parallel>], iteration_bounds = array<i64: 1>, scalar_prefetch = 0 : i64, scratch_operands = 0 : i64, tpu.core_type = #tpu.core_type<tc>, window_params = [{transform_indices = @transform_0, window_bounds = array<i64: 128, 16>}, {pipeline_mode = #tpu.pipeline_mode<synchronous>, transform_indices = @transform_1, window_bounds = array<i64: 16, 40>}, {transform_indices = @transform_2, window_bounds = array<i64: 128, 32>}, {transform_indices = @transform_3, window_bounds = array<i64: 128, 8>}]} {
    %c0 = arith.constant 0 : index
    %c0_0 = arith.constant 0 : index
    %0 = vector.load %arg1[%c0, %c0_0] : memref<128x16xbf16, #tpu.memory_space<vmem>>, vector<128x16xbf16>
    %c0_1 = arith.constant 0 : index
    %c0_2 = arith.constant 0 : index
    %1 = vector.load %arg2[%c0_1, %c0_2] : memref<16x40xbf16, #tpu.memory_space<vmem>>, vector<16x40xbf16>
    %cst = arith.constant dense<0.000000e+00> : vector<128x40xf32>
    %2 = tpu.matmul %0, %1, %cst {dimension_numbers = #tpu.dot_dimension_numbers<[1], [0], [0], [1], [0, 0, 1, 1], [], []>} : vector<128x16xbf16>, vector<16x40xbf16>, vector<128x40xf32> -> vector<128x40xf32>
    %3 = vector.extract_strided_slice %2 {offsets = [0, 0], sizes = [128, 32], strides = [1, 1]} : vector<128x40xf32> to vector<128x32xf32>
    %4 = arith.truncf %3 : vector<128x32xf32> to vector<128x32xbf16>
    %c0_3 = arith.constant 0 : index
    %c0_4 = arith.constant 0 : index
    %5 = vector.load %arg3[%c0_3, %c0_4] : memref<128x32xbf16, #tpu.memory_space<vmem>>, vector<128x32xbf16>
    tpu.vector_store %arg3[%c0_3, %c0_4], %4 {strides = array<i32>} : memref<128x32xbf16, #tpu.memory_space<vmem>>, vector<128x32xbf16>,
    %6 = vector.extract_strided_slice %2 {offsets = [0, 32], sizes = [128, 8], strides = [1, 1]} : vector<128x40xf32> to vector<128x8xf32>
    %c0_5 = arith.constant 0 : index
    %c0_6 = arith.constant 0 : index
    %7 = vector.load %arg4[%c0_5, %c0_6] : memref<128x8xf32, #tpu.memory_space<vmem>>, vector<128x8xf32>
    tpu.vector_store %arg4[%c0_5, %c0_6], %6 {strides = array<i32>} : memref<128x8xf32, #tpu.memory_space<vmem>>, vector<128x8xf32>,
    return
  }
  func.func @transform_0(%arg0: i32) -> (i32, i32) {
    %c0_i32 = arith.constant 0 : i32
    %c0_i32_0 = arith.constant 0 : i32
    return %arg0, %c0_i32 : i32, i32
  }
  func.func @transform_1(%arg0: i32) -> (i32, i32) {
    %c0_i32 = arith.constant 0 : i32
    %c0_i32_0 = arith.constant 0 : i32
    %c0_i32_1 = arith.constant 0 : i32
    return %c0_i32, %c0_i32_0 : i32, i32
  }
  func.func @transform_2(%arg0: i32) -> (i32, i32) {
    %c0_i32 = arith.constant 0 : i32
    %c0_i32_0 = arith.constant 0 : i32
    return %arg0, %c0_i32 : i32, i32
  }
  func.func @transform_3(%arg0: i32) -> (i32, i32) {
    %c0_i32 = arith.constant 0 : i32
    %c0_i32_0 = arith.constant 0 : i32
    return %arg0, %c0_i32 : i32, i32
  }
}

</mosaic_0001>

<bundles_post_ra>
// kernel: tpu_custom_call.1
= control target key start
LH: loop header
LB: loop body
LE: loop exit
PB: predicated region body
PF: predicated region fallthrough
CT: control target
= control target key end

     0   :  { %vm78_vm0 = vcmask 130048   ;;  %vm264_vm1 = vcmask 257024   ;;  %s458_s29 = smov 96   ;;  %vm345_vm2 = vcmask 64512   ;;  %s658_s1 = inlined_call_operand.vmem [shape: bf16[16,40], index: 1, kind: input, shape index: {}]   ;;  %s659_s0 = inlined_call_operand.vmem [shape: bf16[128,16], index: 0, kind: input, shape index: {}]   ;;  %s660_s2 = inlined_call_operand.vmem [shape: bf16[128,32], index: 2, kind: output, shape index: {0}]   ;;  %s661_s3 = inlined_call_operand.vmem [shape: f32[128,8], index: 3, kind: output, shape index: {1}]  }
   0x1   :  { %v449_v0 = vld [vmem:[%s658_s1] sm:$0xff]   ;;  %v452_v3 = vld [vmem:[%s659_s0 + $0x8] sm:$0xff]   ;;  %v454_v5 = vld [vmem:[%s659_s0 + $0x10] sm:$0xff]  }
   0x2   :  { %v450_v1 = vld [vmem:[%s659_s0] sm:$0xff]   ;;  %428 = vmatprep.subr.bf16.mxu0 %v449_v0  ;;  %446 = vmatprep.subr.bf16.mxu1 %v449_v0  ;;  %v453_v4 = vld [vmem:[%s659_s0 + $0x28] sm:$0xff]   ;;  %v456_v6 = vld [vmem:[%s659_s0 + $0x30] sm:$0xff]  }
   0x3   :  { %v451_v2 = vld [vmem:[%s659_s0 + $0x20] sm:$0xff]   ;;  %429 = vmatpush3.bf16.msra.mxu0 %v449_v0  ;;  %447 = vmatpush3.bf16.msra.mxu1 %v449_v0  ;;  %v455_v7 = vld [vmem:[%s659_s0 + $0x18] sm:$0xff]  }
   0x4   :  { %430 = vmatprep.mubr.msk.bf16.mxu0 %vm78_vm0, %v450_v1  ;;  %438 = vmatprep.mubr.msk.bf16.mxu1 %vm78_vm0, %v451_v2  ;;  %v457_v8 = vld [vmem:[%s659_s0 + $0x38] sm:$0xff]  }
   0x6   :  { %431 = vmatmul.mubr.msk.bf16.vlgmr.msra.gmra.mxu0 %vm78_vm0, %v452_v3  ;;  %439 = vmatmul.mubr.msk.bf16.vlgmr.msra.gmra.mxu1 %vm78_vm0, %v453_v4 }
   0x7   :  { %434 = vmatprep.mubr.msk.bf16.mxu0 %vm78_vm0, %v454_v5  ;;  %442 = vmatprep.mubr.msk.bf16.mxu1 %vm78_vm0, %v456_v6 }
   0xe   :  { %435 = vmatmul.mubr.msk.bf16.gmra.mxu0 %vm78_vm0, %v455_v7  ;;  %443 = vmatmul.mubr.msk.bf16.gmra.mxu1 %vm78_vm0, %v457_v8 }
  0xc6   :  { %v432_v9 = vpop.f32.mrf.mxu0  ;;  %v440_v10 = vpop.f32.mrf.mxu1 }
  0xc7   :  { %v405_v11 = vpack.c.bf16 %v432_v9, %v432_v9  ;;  %v413_v12 = vpack.c.bf16 %v440_v10, %v440_v10  ;;  %317 = vrot.lane.b32.xlu0 %v440_v10, %s458_s29  ;;  %301 = vrot.lane.b32.xlu1 %v432_v9, %s458_s29 }
  0xc8   :  { %v137_v13 = vpop.f32.mrf.mxu0  ;;  %v169_v14 = vpop.f32.mrf.mxu1 }
  0xc9   :  { %267 = vst.msk [vmem:[%s660_s2 + $0x8] sm:$0xf] %vm264_vm1, %v405_v11  ;;  %275 = vst.msk [vmem:[%s660_s2 + $0x28] sm:$0xf] %vm264_vm1, %v413_v12  ;;  %v403_v15 = vpack.c.bf16 %v137_v13, %v137_v13  ;;  %v411_v16 = vpack.c.bf16 %v169_v14, %v169_v14 }
  0xca   :  { %v433_v17 = vpop.f32.mrf.mxu0  ;;  %v441_v18 = vpop.f32.mrf.mxu1 }
  0xcb   :  { %265 = vst.msk [vmem:[%s660_s2] sm:$0xf] %vm264_vm1, %v403_v15  ;;  %273 = vst.msk [vmem:[%s660_s2 + $0x20] sm:$0xf] %vm264_vm1, %v411_v16  ;;  %v406_v19 = vpack.c.bf16 %v433_v17, %v433_v17  ;;  %v414_v20 = vpack.c.bf16 %v441_v18, %v441_v18  ;;  %297 = vrot.lane.b32.xlu0 %v137_v13, %s458_s29  ;;  %303 = vrot.lane.b32.xlu1 %v433_v17, %s458_s29 }
  0xcc   :  { %v140_v21 = vpop.f32.mrf.mxu0  ;;  %v172_v22 = vpop.f32.mrf.mxu1 }
  0xcd   :  { %268 = vst.msk [vmem:[%s660_s2 + $0xc] sm:$0xf] %vm264_vm1, %v406_v19  ;;  %276 = vst.msk [vmem:[%s660_s2 + $0x2c] sm:$0xf] %vm264_vm1, %v414_v20  ;;  %v404_v23 = vpack.c.bf16 %v140_v21, %v140_v21  ;;  %v412_v24 = vpack.c.bf16 %v172_v22, %v172_v22 }
  0xce   :  { %v436_v25 = vpop.f32.mrf.mxu0  ;;  %v444_v26 = vpop.f32.mrf.mxu1 }
  0xcf   :  { %266 = vst.msk [vmem:[%s660_s2 + $0x4] sm:$0xf] %vm264_vm1, %v404_v23  ;;  %274 = vst.msk [vmem:[%s660_s2 + $0x24] sm:$0xf] %vm264_vm1, %v412_v24  ;;  %v409_v27 = vpack.c.bf16 %v436_v25, %v436_v25  ;;  %313 = vrot.lane.b32.xlu0 %v169_v14, %s458_s29  ;;  %319 = vrot.lane.b32.xlu1 %v441_v18, %s458_s29  ;;  %v417_v28 = vpack.c.bf16 %v444_v26, %v444_v26 }
  0xd0   :  { %v153_v29 = vpop.f32.mrf.mxu0  ;;  %v185_v30 = vpop.f32.mrf.mxu1 }
  0xd1   :  { %271 = vst.msk [vmem:[%s660_s2 + $0x18] sm:$0xf] %vm264_vm1, %v409_v27  ;;  %v407_v31 = vpack.c.bf16 %v153_v29, %v153_v29  ;;  %279 = vst.msk [vmem:[%s660_s2 + $0x38] sm:$0xf] %vm264_vm1, %v417_v28  ;;  %v415_v32 = vpack.c.bf16 %v185_v30, %v185_v30 }
  0xd2   :  { %v437_v33 = vpop.f32.mrf.mxu0  ;;  %v445_v34 = vpop.f32.mrf.mxu1 }
  0xd3   :  { %269 = vst.msk [vmem:[%s660_s2 + $0x10] sm:$0xf] %vm264_vm1, %v407_v31  ;;  %v410_v35 = vpack.c.bf16 %v437_v33, %v437_v33  ;;  %315 = vrot.lane.b32.xlu1 %v172_v22, %s458_s29  ;;  %299 = vrot.lane.b32.xlu0 %v140_v21, %s458_s29  ;;  %277 = vst.msk [vmem:[%s660_s2 + $0x30] sm:$0xf] %vm264_vm1, %v415_v32  ;;  %v418_v36 = vpack.c.bf16 %v445_v34, %v445_v34 }
  0xd4   :  { %v156_v37 = vpop.f32.mrf.mxu0  ;;  %v188_v38 = vpop.f32.mrf.mxu1 }
  0xd5   :  { %272 = vst.msk [vmem:[%s660_s2 + $0x1c] sm:$0xf] %vm264_vm1, %v410_v35  ;;  %v408_v39 = vpack.c.bf16 %v156_v37, %v156_v37  ;;  %280 = vst.msk [vmem:[%s660_s2 + $0x3c] sm:$0xf] %vm264_vm1, %v418_v36  ;;  %v416_v40 = vpack.c.bf16 %v188_v38, %v188_v38 }
  0xd7   :  { %270 = vst.msk [vmem:[%s660_s2 + $0x14] sm:$0xf] %vm264_vm1, %v408_v39  ;;  %309 = vrot.lane.b32.xlu0 %v436_v25, %s458_s29  ;;  %311 = vrot.lane.b32.xlu1 %v437_v33, %s458_s29  ;;  %278 = vst.msk [vmem:[%s660_s2 + $0x34] sm:$0xf] %vm264_vm1, %v416_v40 }
  0xdb   :  { %305 = vrot.lane.b32.xlu0 %v153_v29, %s458_s29  ;;  %307 = vrot.lane.b32.xlu1 %v156_v37, %s458_s29 }
  0xdf   :  { %321 = vrot.lane.b32.xlu0 %v185_v30, %s458_s29  ;;  %323 = vrot.lane.b32.xlu1 %v188_v38, %s458_s29 }
  0xe3   :  { %325 = vrot.lane.b32.xlu0 %v444_v26, %s458_s29  ;;  %327 = vrot.lane.b32.xlu1 %v445_v34, %s458_s29 }
 0x139   :  { %v318_v41 = vpop.permute.xlu0 %317  ;;  %v302_v42 = vpop.permute.xlu1 %301 }
 0x13a   :  { %356 = vst.msk [vmem:[%s661_s3 + $0x50] sm:$0xff] %vm345_vm2, %v318_v41  ;;  %348 = vst.msk [vmem:[%s661_s3 + $0x10] sm:$0xff] %vm345_vm2, %v302_v42 }
 0x13d   :  { %v298_v43 = vpop.permute.xlu0 %297  ;;  %v304_v44 = vpop.permute.xlu1 %303 }
 0x13e   :  { %346 = vst.msk [vmem:[%s661_s3] sm:$0xff] %vm345_vm2, %v298_v43  ;;  %349 = vst.msk [vmem:[%s661_s3 + $0x18] sm:$0xff] %vm345_vm2, %v304_v44 }
 0x141   :  { %v314_v45 = vpop.permute.xlu0 %313  ;;  %v320_v46 = vpop.permute.xlu1 %319 }
 0x142   :  { %354 = vst.msk [vmem:[%s661_s3 + $0x40] sm:$0xff] %vm345_vm2, %v314_v45  ;;  %357 = vst.msk [vmem:[%s661_s3 + $0x58] sm:$0xff] %vm345_vm2, %v320_v46 }
 0x145   :  { %v316_v47 = vpop.permute.xlu1 %315  ;;  %v300_v48 = vpop.permute.xlu0 %299 }
 0x146   :  { %355 = vst.msk [vmem:[%s661_s3 + $0x48] sm:$0xff] %vm345_vm2, %v316_v47  ;;  %347 = vst.msk [vmem:[%s661_s3 + $0x8] sm:$0xff] %vm345_vm2, %v300_v48 }
 0x149   :  { %v310_v49 = vpop.permute.xlu0 %309  ;;  %v312_v50 = vpop.permute.xlu1 %311 }
 0x14a   :  { %352 = vst.msk [vmem:[%s661_s3 + $0x30] sm:$0xff] %vm345_vm2, %v310_v49  ;;  %353 = vst.msk [vmem:[%s661_s3 + $0x38] sm:$0xff] %vm345_vm2, %v312_v50 }
 0x14d   :  { %v306_v51 = vpop.permute.xlu0 %305  ;;  %v308_v52 = vpop.permute.xlu1 %307 }
 0x14e   :  { %350 = vst.msk [vmem:[%s661_s3 + $0x20] sm:$0xff] %vm345_vm2, %v306_v51  ;;  %351 = vst.msk [vmem:[%s661_s3 + $0x28] sm:$0xff] %vm345_vm2, %v308_v52 }
 0x151   :  { %v322_v53 = vpop.permute.xlu0 %321  ;;  %v324_v54 = vpop.permute.xlu1 %323 }
 0x152   :  { %358 = vst.msk [vmem:[%s661_s3 + $0x60] sm:$0xff] %vm345_vm2, %v322_v53  ;;  %359 = vst.msk [vmem:[%s661_s3 + $0x68] sm:$0xff] %vm345_vm2, %v324_v54 }
 0x155   :  { %v326_v55 = vpop.permute.xlu0 %325  ;;  %v328_v56 = vpop.permute.xlu1 %327 }
 0x156   :  { %360 = vst.msk [vmem:[%s661_s3 + $0x70] sm:$0xff] %vm345_vm2, %v326_v55  ;;  %361 = vst.msk [vmem:[%s661_s3 + $0x78] sm:$0xff] %vm345_vm2, %v328_v56 }

</bundles_post_ra>
